<compile_context>
chip_gen: v7x
topology: tpu7x:2x2x1
jax: 0.10.0
libtpu: 0.0.40
codegen_flags: <defaults>
</compile_context>

<pallas_src>
import jax
import jax.numpy as jnp
from jax.experimental import pallas as pl
from jax.experimental.pallas import tpu as pltpu

OC = 5                   # out_channel of each CNN branch
IN_GNN = 5               # input_size_gnn
FC1_IN = 12 + 4 * OC     # 32
FC1_OUT = 20
GNN_H = 20               # hidden width of gnn1
NCONV = 4 * OC           # 20: concatenated conv-branch width
WCOMB = NCONV + FC1_OUT  # 40: merged feat-matmul RHS width


# ---------------------------------------------------------------------------
# Fused kernel: 4x Conv1d(+ReLU) -> fc1(+ReLU) -> (fc2 folded) SAGEConv ->
# SAGEConv.  One grid step processes TB whole graphs (R = TB*N rows).
# ---------------------------------------------------------------------------
def fused_kernel(feat_ref, wf_ref, w14_ref, wh_ref, wl2_ref, wr2_ref,
                 a_ref, bias_ref, o_ref):
    f32, bf16 = jnp.float32, jnp.bfloat16
    # Packed f32 biases: row 0 = conv bias, 1 = fc1 bias, 2 = cl (= b2@wl1,
    # flows through the aggregation), 3 = bl1 + b2@wr1, 4 lane 0 = final bl2.
    bc = bias_ref[0:1, 0:NCONV]
    b1 = bias_ref[1:2, 0:FC1_OUT]
    cl = bias_ref[2:3, 0:GNN_H]
    crbl1 = bias_ref[3:4, 0:GNN_H]
    bl2 = bias_ref[4:5, 0:1]

    feat = feat_ref[...]                                              # (R, F) bf16

    # Single MXU pass over feat: lanes [0:20] = the four Conv1d branches
    # (kernel spans the whole 24-wide window -> block-diagonal matmul),
    # lanes [20:40] = fc1 acting on the raw first 12 features.
    u = jnp.dot(feat, wf_ref[...], preferred_element_type=f32)        # (R, 40)
    c = jnp.maximum(u[:, :NCONV] + bc, 0.0)                           # conv + ReLU
    h = jnp.maximum(
        jnp.dot(c.astype(bf16), w14_ref[...], preferred_element_type=f32)
        + u[:, NCONV:] + b1, 0.0)                                     # fc1 + ReLU
    hb = h.astype(bf16)                                               # (R, 20)

    # fc2 folded into SAGEConv-1: v = h @ [w2@wl1 | w2@wr1].
    v = jnp.dot(hb, wh_ref[...], preferred_element_type=f32)          # (R, 40)
    y_l = v[:, :GNN_H] + cl                                           # goes through A
    a_blk = a_ref[...]                                                # (R, R) bf16
    agg1 = jnp.dot(a_blk, y_l.astype(bf16), preferred_element_type=f32)
    h1 = agg1 + v[:, GNN_H:] + crbl1                                  # (R, 20)
    h1b = h1.astype(bf16)

    # SAGEConv-2.
    agg2 = jnp.dot(a_blk, h1b, preferred_element_type=f32)            # (R, 20)
    g = (jnp.dot(agg2.astype(bf16), wl2_ref[...], preferred_element_type=f32)
         + jnp.dot(h1b, wr2_ref[...], preferred_element_type=f32))    # (R, 1)

    # Lane-dense flat write: one small XLU transpose puts the R node values on
    # the lane axis; unmasked stores, no selection matmul, no reshape needed.
    o_ref[...] = jnp.transpose(g) + bl2                               # (1, R)


# ---------------------------------------------------------------------------
# Parameter init (deterministic, PyTorch weight layouts: Linear = (out, in))
# ---------------------------------------------------------------------------
def init_params(key):
    ks = jax.random.split(key, 20)
    r = lambda k, s: 0.1 * jax.random.normal(k, s, jnp.float32)
    return {
        # Conv1d(1, OC, 24) per branch: weight (OC, 24) (in_ch squeezed), bias (OC,)
        "wt": r(ks[0], (OC, 24)),   "bt": r(ks[1], (OC,)),
        "wr": r(ks[2], (OC, 24)),   "br": r(ks[3], (OC,)),
        "wtp": r(ks[4], (OC, 24)),  "btp": r(ks[5], (OC,)),
        "wssr": r(ks[6], (OC, 24)), "bssr": r(ks[7], (OC,)),
        "fc1_w": r(ks[8], (FC1_OUT, FC1_IN)), "fc1_b": r(ks[9], (FC1_OUT,)),
        "fc2_w": r(ks[10], (IN_GNN, FC1_OUT)), "fc2_b": r(ks[11], (IN_GNN,)),
        # SAGEConv(IN_GNN, 20): lin_l (with bias) on aggregated, lin_r on root
        "g1_wl": r(ks[12], (GNN_H, IN_GNN)), "g1_bl": r(ks[13], (GNN_H,)),
        "g1_wr": r(ks[14], (GNN_H, IN_GNN)),
        # SAGEConv(20, 1)
        "g2_wl": r(ks[15], (1, GNN_H)), "g2_bl": r(ks[16], (1,)),
        "g2_wr": r(ks[17], (1, GNN_H)),
    }
    # NOTE: self.gnn / self.avg / layers_gnn are unused in the torch forward.


def build_adjacency(edge_index, n_nodes):
    # SAGEConv mean aggregation: agg[i] = mean_{(j->i) in edges} x[j]
    src = edge_index[0]
    dst = edge_index[1]
    A = jnp.zeros((n_nodes, n_nodes), jnp.float32).at[dst, src].add(1.0)
    deg = A.sum(axis=1, keepdims=True)
    return jnp.where(deg > 0, A / jnp.maximum(deg, 1.0), 0.0)


def _pack_weights(params, F):
    """Pack torch-layout weights into the fused-kernel layouts (bf16 operands,
    f32 bias block)."""
    f32, bf16 = jnp.float32, jnp.bfloat16
    conv_ws = [params["wt"], params["wr"], params["wtp"], params["wssr"]]
    conv_bs = [params["bt"], params["br"], params["btp"], params["bssr"]]
    w1t = params["fc1_w"].T                                  # (32, 20)

    # Merged (F, 40) RHS for the single feat matmul:
    #   cols [0:20]  block-diagonal Conv1d weights (act on feat[:, 12:108])
    #   cols [20:40] fc1 rows acting on the raw feat[:, :12]
    wf = jnp.zeros((F, WCOMB), f32)
    for k, w in enumerate(conv_ws):
        wf = wf.at[12 + 24 * k:12 + 24 * (k + 1), OC * k:OC * (k + 1)].set(w.T)
    wf = wf.at[:12, NCONV:].set(w1t[:12])

    w14 = w1t[12:12 + NCONV]                                 # (20, 20): fc1 on conv outs

    # Fold fc2 into SAGEConv-1 (exact):
    #   x_g = h@w2 + b2 ;  agg1@wl1 = A@(x_g@wl1) = A@(h@(w2@wl1) + b2@wl1)
    w2 = params["fc2_w"].T                                   # (20, 5)
    b2 = params["fc2_b"].reshape(1, IN_GNN)                  # (1, 5)
    wl1 = params["g1_wl"].T                                  # (5, 20)
    wr1 = params["g1_wr"].T                                  # (5, 20)
    wh = jnp.concatenate([w2 @ wl1, w2 @ wr1], axis=1)       # (20, 40)
    cl = (b2 @ wl1).reshape(GNN_H)
    crbl1 = (b2 @ wr1).reshape(GNN_H) + params["g1_bl"]

    wl2 = params["g2_wl"].T                                  # (20, 1)
    wr2 = params["g2_wr"].T                                  # (20, 1)

    # One (8, 128) f32 bias block (rows = which bias, lanes = channels).
    bias = (jnp.zeros((8, 128), f32)
            .at[0, :NCONV].set(jnp.concatenate(conv_bs))
            .at[1, :FC1_OUT].set(params["fc1_b"])
            .at[2, :GNN_H].set(cl)
            .at[3, :GNN_H].set(crbl1)
            .at[4, 0].set(params["g2_bl"][0]))

    cast = lambda a: a.astype(bf16)
    return cast(wf), cast(w14), cast(wh), cast(wl2), cast(wr2), bias


def _choose_tb(B, N, max_rows=512):
    """Batch tile TB (R = TB*N rows per grid step).

    TB == B (single step, blocks == full array dims, always legal) whenever the
    whole problem fits the row budget.  Otherwise pick the largest divisor of B
    whose row count is a multiple of 128, so both the (R, F) input block and the
    lane-dense (1, R) output block satisfy the (8, 128) tiling rule.  max_rows
    caps R because the dense block-diagonal adjacency costs O(R^2) MXU work /
    VMEM while useful work grows only O(R).
    """
    if B * N <= max_rows:
        return B
    for t in range(B, 0, -1):
        if B % t == 0 and t * N <= max_rows and (t * N) % 128 == 0:
            return t
    return B   # fallback: single step; blocks equal full dims (always legal)


# ---------------------------------------------------------------------------
# Forward wrapper (only free views + tiny constant packing outside the kernel)
# ---------------------------------------------------------------------------
@jax.jit
def forward(params, x, edge_index):
    B, S, N, F = x.shape
    assert S == 1 and F >= 108, "torch module requires S==1 and F>=108"

    # B-major row flattening: (B, 1, N, F) -> (B*N, F) is a free view; the
    # (B, N) regrouping for the GNN and the final (B, 1, N) reshape are free
    # too.  bf16 operands halve the per-step feat DMA; accumulation stays f32.
    feat = x.reshape(B * N, F).astype(jnp.bfloat16)

    A = build_adjacency(edge_index, N)                        # (N, N) f32
    TB = _choose_tb(B, N)
    R, GB = TB * N, B // TB
    # Block-diagonal adjacency aggregates TB whole graphs per matmul.
    # TODO(synk): for large TB the dense kron multiplies mostly-zero blocks
    # (O(R^2) cost vs O(R) useful work); a per-graph aggregation loop would fix
    # it — for now _choose_tb caps R at 512 instead.
    a_blk = jnp.kron(jnp.eye(TB, dtype=jnp.float32), A).astype(jnp.bfloat16)

    wf, w14, wh, wl2, wr2, bias = _pack_weights(params, F)

    def inv(shape):   # grid-invariant block (stays resident across grid steps)
        return pl.BlockSpec(shape, lambda g: (0, 0))

    out = pl.pallas_call(
        fused_kernel,
        grid=(GB,),
        in_specs=[
            pl.BlockSpec((R, F), lambda g: (g, 0)),   # rows of TB whole graphs
            inv((F, WCOMB)),                          # merged conv | fc1a weight
            inv((NCONV, FC1_OUT)),                    # fc1 on conv outputs
            inv((FC1_OUT, 2 * GNN_H)),                # folded [w2@wl1 | w2@wr1]
            inv((GNN_H, 1)),                          # SAGE2 lin_l
            inv((GNN_H, 1)),                          # SAGE2 lin_r
            inv((R, R)),                              # block-diag adjacency
            inv((8, 128)),                            # packed bias block
        ],
        out_specs=pl.BlockSpec((1, R), lambda g: (0, g)),
        out_shape=jax.ShapeDtypeStruct((1, B * N), jnp.float32),
        compiler_params=pltpu.CompilerParams(
            dimension_semantics=("parallel",)),
    )(feat, wf, w14, wh, wl2, wr2, a_blk, bias)

    return out.reshape(B, 1, N)          # torch layout (B, 1, N) — free reshape


# ---------------------------------------------------------------------------
# Pure-JAX f32 reference (follows the torch N-major code path exactly)
# ---------------------------------------------------------------------------
def ref_forward(params, x, edge_index):
    B, S, N, F = x.shape
    feat = jnp.transpose(x, (2, 0, 1, 3)).reshape(N * B, F).astype(jnp.float32)

    def branch(sl, w, b):
        return jnp.maximum(feat[:, sl] @ w.T + b, 0.0)

    ct = branch(slice(12, 36), params["wt"], params["bt"])
    cr = branch(slice(36, 60), params["wr"], params["br"])
    ctp = branch(slice(60, 84), params["wtp"], params["btp"])
    cssr = branch(slice(84, 108), params["wssr"], params["bssr"])
    h = jnp.concatenate([feat[:, :12], ct, cr, ctp, cssr], axis=1)
    h = jnp.maximum(h @ params["fc1_w"].T + params["fc1_b"], 0.0)
    h = h @ params["fc2_w"].T + params["fc2_b"]
    xg = h.reshape(N, B, IN_GNN).transpose(1, 0, 2)

    A = build_adjacency(edge_index, N)

    def sage(X, wl, bl, wr):
        return (A @ X) @ wl.T + bl + X @ wr.T

    outs = []
    for b in range(B):
        h1 = sage(xg[b], params["g1_wl"], params["g1_bl"], params["g1_wr"])
        h2 = sage(h1, params["g2_wl"], params["g2_bl"], params["g2_wr"])
        outs.append(h2)
    return jnp.transpose(jnp.stack(outs), (0, 2, 1))


if __name__ == "__main__":
    key = jax.random.PRNGKey(0)
    kp, kx = jax.random.split(key)
    params = init_params(kp)

    B, S, N, F = 2, 1, 4, 108          # S must be 1 (Conv1d in_channels=1)
    x = jax.random.normal(kx, (B, S, N, F), jnp.float32)
    edge_index = jnp.array([[0, 1, 2, 3, 1],
                            [1, 2, 3, 0, 3]], dtype=jnp.int32)

    out = forward(params, x, edge_index)
    out = jax.block_until_ready(out)
    assert out.shape == (B, 1, N), out.shape

    ref = ref_forward(params, x, edge_index)
    # Tolerance loosened vs the f32 version: operands are bf16 (accumulation
    # stays f32); logic errors would be an order of magnitude larger than this.
    assert jnp.allclose(out, ref, atol=2e-2, rtol=2e-2), (out, ref)

    print("KERNEL_OK")
</pallas_src>

<mosaic_0001>
module attributes {stable_mosaic.version = 11 : i64} {
  func.func @fused_kernel(%arg0: i32, %arg1: memref<8x108xbf16, #tpu.memory_space<vmem>>, %arg2: memref<108x40xbf16, #tpu.memory_space<vmem>>, %arg3: memref<20x20xbf16, #tpu.memory_space<vmem>>, %arg4: memref<20x40xbf16, #tpu.memory_space<vmem>>, %arg5: memref<20x1xbf16, #tpu.memory_space<vmem>>, %arg6: memref<20x1xbf16, #tpu.memory_space<vmem>>, %arg7: memref<8x8xbf16, #tpu.memory_space<vmem>>, %arg8: memref<8x128xf32, #tpu.memory_space<vmem>>, %arg9: memref<1x8xf32, #tpu.memory_space<vmem>>) attributes {dimension_semantics = [#tpu.dimension_semantics<parallel>], iteration_bounds = array<i64: 1>, scalar_prefetch = 0 : i64, scratch_operands = 0 : i64, tpu.core_type = #tpu.core_type<tc>, window_params = [{transform_indices = @transform_0, window_bounds = array<i64: 8, 108>}, {pipeline_mode = #tpu.pipeline_mode<synchronous>, transform_indices = @transform_1, window_bounds = array<i64: 108, 40>}, {pipeline_mode = #tpu.pipeline_mode<synchronous>, transform_indices = @transform_2, window_bounds = array<i64: 20, 20>}, {pipeline_mode = #tpu.pipeline_mode<synchronous>, transform_indices = @transform_3, window_bounds = array<i64: 20, 40>}, {pipeline_mode = #tpu.pipeline_mode<synchronous>, transform_indices = @transform_4, window_bounds = array<i64: 20, 1>}, {pipeline_mode = #tpu.pipeline_mode<synchronous>, transform_indices = @transform_5, window_bounds = array<i64: 20, 1>}, {pipeline_mode = #tpu.pipeline_mode<synchronous>, transform_indices = @transform_6, window_bounds = array<i64: 8, 8>}, {pipeline_mode = #tpu.pipeline_mode<synchronous>, transform_indices = @transform_7, window_bounds = array<i64: 8, 128>}, {transform_indices = @transform_8, window_bounds = array<i64: 1, 8>}]} {
    %c0 = arith.constant 0 : index
    %c0_0 = arith.constant 0 : index
    %0 = vector.load %arg8[%c0, %c0_0] : memref<8x128xf32, #tpu.memory_space<vmem>>, vector<1x20xf32>
    %c1 = arith.constant 1 : index
    %c0_1 = arith.constant 0 : index
    %1 = vector.load %arg8[%c1, %c0_1] : memref<8x128xf32, #tpu.memory_space<vmem>>, vector<1x20xf32>
    %c2 = arith.constant 2 : index
    %c0_2 = arith.constant 0 : index
    %2 = vector.load %arg8[%c2, %c0_2] : memref<8x128xf32, #tpu.memory_space<vmem>>, vector<1x20xf32>
    %c3 = arith.constant 3 : index
    %c0_3 = arith.constant 0 : index
    %3 = vector.load %arg8[%c3, %c0_3] : memref<8x128xf32, #tpu.memory_space<vmem>>, vector<1x20xf32>
    %c4 = arith.constant 4 : index
    %c0_4 = arith.constant 0 : index
    %4 = vector.load %arg8[%c4, %c0_4] : memref<8x128xf32, #tpu.memory_space<vmem>>, vector<1x1xf32>
    %c0_5 = arith.constant 0 : index
    %c0_6 = arith.constant 0 : index
    %5 = vector.load %arg1[%c0_5, %c0_6] : memref<8x108xbf16, #tpu.memory_space<vmem>>, vector<8x108xbf16>
    %c0_7 = arith.constant 0 : index
    %c0_8 = arith.constant 0 : index
    %6 = vector.load %arg2[%c0_7, %c0_8] : memref<108x40xbf16, #tpu.memory_space<vmem>>, vector<108x40xbf16>
    %cst = arith.constant dense<0.000000e+00> : vector<8x40xf32>
    %7 = tpu.matmul %5, %6, %cst {dimension_numbers = #tpu.dot_dimension_numbers<[1], [0], [0], [1], [0, 0, 1, 1], [], []>} : vector<8x108xbf16>, vector<108x40xbf16>, vector<8x40xf32> -> vector<8x40xf32>
    %8 = vector.extract_strided_slice %7 {offsets = [0, 0], sizes = [8, 20], strides = [1, 1]} : vector<8x40xf32> to vector<8x20xf32>
    %9 = vector.broadcast %0 : vector<1x20xf32> to vector<8x20xf32>
    %10 = arith.addf %8, %9 : vector<8x20xf32>
    %cst_9 = arith.constant 0.000000e+00 : f32
    %11 = vector.broadcast %cst_9 : f32 to vector<8x20xf32>
    %12 = arith.maximumf %10, %11 : vector<8x20xf32>
    %13 = arith.truncf %12 : vector<8x20xf32> to vector<8x20xbf16>
    %c0_10 = arith.constant 0 : index
    %c0_11 = arith.constant 0 : index
    %14 = vector.load %arg3[%c0_10, %c0_11] : memref<20x20xbf16, #tpu.memory_space<vmem>>, vector<20x20xbf16>
    %cst_12 = arith.constant dense<0.000000e+00> : vector<8x20xf32>
    %15 = tpu.matmul %13, %14, %cst_12 {dimension_numbers = #tpu.dot_dimension_numbers<[1], [0], [0], [1], [0, 0, 1, 1], [], []>} : vector<8x20xbf16>, vector<20x20xbf16>, vector<8x20xf32> -> vector<8x20xf32>
    %16 = vector.extract_strided_slice %7 {offsets = [0, 20], sizes = [8, 20], strides = [1, 1]} : vector<8x40xf32> to vector<8x20xf32>
    %17 = arith.addf %15, %16 : vector<8x20xf32>
    %18 = vector.broadcast %1 : vector<1x20xf32> to vector<8x20xf32>
    %19 = arith.addf %17, %18 : vector<8x20xf32>
    %cst_13 = arith.constant 0.000000e+00 : f32
    %20 = vector.broadcast %cst_13 : f32 to vector<8x20xf32>
    %21 = arith.maximumf %19, %20 : vector<8x20xf32>
    %22 = arith.truncf %21 : vector<8x20xf32> to vector<8x20xbf16>
    %c0_14 = arith.constant 0 : index
    %c0_15 = arith.constant 0 : index
    %23 = vector.load %arg4[%c0_14, %c0_15] : memref<20x40xbf16, #tpu.memory_space<vmem>>, vector<20x40xbf16>
    %cst_16 = arith.constant dense<0.000000e+00> : vector<8x40xf32>
    %24 = tpu.matmul %22, %23, %cst_16 {dimension_numbers = #tpu.dot_dimension_numbers<[1], [0], [0], [1], [0, 0, 1, 1], [], []>} : vector<8x20xbf16>, vector<20x40xbf16>, vector<8x40xf32> -> vector<8x40xf32>
    %25 = vector.extract_strided_slice %24 {offsets = [0, 0], sizes = [8, 20], strides = [1, 1]} : vector<8x40xf32> to vector<8x20xf32>
    %26 = vector.broadcast %2 : vector<1x20xf32> to vector<8x20xf32>
    %27 = arith.addf %25, %26 : vector<8x20xf32>
    %c0_17 = arith.constant 0 : index
    %c0_18 = arith.constant 0 : index
    %28 = vector.load %arg7[%c0_17, %c0_18] : memref<8x8xbf16, #tpu.memory_space<vmem>>, vector<8x8xbf16>
    %29 = arith.truncf %27 : vector<8x20xf32> to vector<8x20xbf16>
    %cst_19 = arith.constant dense<0.000000e+00> : vector<8x20xf32>
    %30 = tpu.matmul %28, %29, %cst_19 {dimension_numbers = #tpu.dot_dimension_numbers<[1], [0], [0], [1], [0, 0, 1, 1], [], []>} : vector<8x8xbf16>, vector<8x20xbf16>, vector<8x20xf32> -> vector<8x20xf32>
    %31 = vector.extract_strided_slice %24 {offsets = [0, 20], sizes = [8, 20], strides = [1, 1]} : vector<8x40xf32> to vector<8x20xf32>
    %32 = arith.addf %30, %31 : vector<8x20xf32>
    %33 = vector.broadcast %3 : vector<1x20xf32> to vector<8x20xf32>
    %34 = arith.addf %32, %33 : vector<8x20xf32>
    %35 = arith.truncf %34 : vector<8x20xf32> to vector<8x20xbf16>
    %cst_20 = arith.constant dense<0.000000e+00> : vector<8x20xf32>
    %36 = tpu.matmul %28, %35, %cst_20 {dimension_numbers = #tpu.dot_dimension_numbers<[1], [0], [0], [1], [0, 0, 1, 1], [], []>} : vector<8x8xbf16>, vector<8x20xbf16>, vector<8x20xf32> -> vector<8x20xf32>
    %37 = arith.truncf %36 : vector<8x20xf32> to vector<8x20xbf16>
    %c0_21 = arith.constant 0 : index
    %c0_22 = arith.constant 0 : index
    %38 = vector.load %arg5[%c0_21, %c0_22] : memref<20x1xbf16, #tpu.memory_space<vmem>>, vector<20x1xbf16>
    %cst_23 = arith.constant dense<0.000000e+00> : vector<8x1xf32>
    %39 = tpu.matmul %37, %38, %cst_23 {dimension_numbers = #tpu.dot_dimension_numbers<[1], [0], [0], [1], [0, 0, 1, 1], [], []>} : vector<8x20xbf16>, vector<20x1xbf16>, vector<8x1xf32> -> vector<8x1xf32>
    %c0_24 = arith.constant 0 : index
    %c0_25 = arith.constant 0 : index
    %40 = vector.load %arg6[%c0_24, %c0_25] : memref<20x1xbf16, #tpu.memory_space<vmem>>, vector<20x1xbf16>
    %cst_26 = arith.constant dense<0.000000e+00> : vector<8x1xf32>
    %41 = tpu.matmul %35, %40, %cst_26 {dimension_numbers = #tpu.dot_dimension_numbers<[1], [0], [0], [1], [0, 0, 1, 1], [], []>} : vector<8x20xbf16>, vector<20x1xbf16>, vector<8x1xf32> -> vector<8x1xf32>
    %42 = arith.addf %39, %41 : vector<8x1xf32>
    %43 = tpu.transpose %42, [1, 0] : vector<8x1xf32> -> vector<1x8xf32>
    %44 = vector.broadcast %4 : vector<1x1xf32> to vector<1x8xf32>
    %45 = arith.addf %43, %44 : vector<1x8xf32>
    %c0_27 = arith.constant 0 : index
    %c0_28 = arith.constant 0 : index
    %46 = vector.load %arg9[%c0_27, %c0_28] : memref<1x8xf32, #tpu.memory_space<vmem>>, vector<1x8xf32>
    tpu.vector_store %arg9[%c0_27, %c0_28], %45 {strides = array<i32>} : memref<1x8xf32, #tpu.memory_space<vmem>>, vector<1x8xf32>,
    return
  }
  func.func @transform_0(%arg0: i32) -> (i32, i32) {
    %c0_i32 = arith.constant 0 : i32
    %c0_i32_0 = arith.constant 0 : i32
    return %arg0, %c0_i32 : i32, i32
  }
  func.func @transform_1(%arg0: i32) -> (i32, i32) {
    %c0_i32 = arith.constant 0 : i32
    %c0_i32_0 = arith.constant 0 : i32
    %c0_i32_1 = arith.constant 0 : i32
    return %c0_i32, %c0_i32_0 : i32, i32
  }
  func.func @transform_2(%arg0: i32) -> (i32, i32) {
    %c0_i32 = arith.constant 0 : i32
    %c0_i32_0 = arith.constant 0 : i32
    %c0_i32_1 = arith.constant 0 : i32
    return %c0_i32, %c0_i32_0 : i32, i32
  }
  func.func @transform_3(%arg0: i32) -> (i32, i32) {
    %c0_i32 = arith.constant 0 : i32
    %c0_i32_0 = arith.constant 0 : i32
    %c0_i32_1 = arith.constant 0 : i32
    return %c0_i32, %c0_i32_0 : i32, i32
  }
  func.func @transform_4(%arg0: i32) -> (i32, i32) {
    %c0_i32 = arith.constant 0 : i32
    %c0_i32_0 = arith.constant 0 : i32
    %c0_i32_1 = arith.constant 0 : i32
    return %c0_i32, %c0_i32_0 : i32, i32
  }
  func.func @transform_5(%arg0: i32) -> (i32, i32) {
    %c0_i32 = arith.constant 0 : i32
    %c0_i32_0 = arith.constant 0 : i32
    %c0_i32_1 = arith.constant 0 : i32
    return %c0_i32, %c0_i32_0 : i32, i32
  }
  func.func @transform_6(%arg0: i32) -> (i32, i32) {
    %c0_i32 = arith.constant 0 : i32
    %c0_i32_0 = arith.constant 0 : i32
    %c0_i32_1 = arith.constant 0 : i32
    return %c0_i32, %c0_i32_0 : i32, i32
  }
  func.func @transform_7(%arg0: i32) -> (i32, i32) {
    %c0_i32 = arith.constant 0 : i32
    %c0_i32_0 = arith.constant 0 : i32
    %c0_i32_1 = arith.constant 0 : i32
    return %c0_i32, %c0_i32_0 : i32, i32
  }
  func.func @transform_8(%arg0: i32) -> (i32, i32) {
    %c0_i32 = arith.constant 0 : i32
    %c0_i32_0 = arith.constant 0 : i32
    return %c0_i32, %arg0 : i32, i32
  }
}

</mosaic_0001>

<bundles_post_ra>
// kernel: forward.1
= control target key start
LH: loop header
LB: loop body
LE: loop exit
PB: predicated region body
PF: predicated region fallthrough
CT: control target
= control target key end

     0   :  { %v677_v0 = vmov 0.0   ;;  %vm678_vm0 = vmmov 0   ;;  %vm95_vm1 = vcmask 1045504   ;;  %vm91_vm2 = vcmask 883712   ;;  %s679_s25 = smov 108   ;;  %s840_s1 = inlined_call_operand.vmem [shape: bf16[108,40], index: 1, kind: input, shape index: {}]   ;;  %s841_s0 = inlined_call_operand.vmem [shape: bf16[8,108], index: 0, kind: input, shape index: {}]   ;;  %s842_s2 = inlined_call_operand.vmem [shape: bf16[20,20], index: 2, kind: input, shape index: {}]   ;;  %s843_s7 = inlined_call_operand.vmem [shape: f32[8,128], index: 7, kind: input, shape index: {}]   ;;  %s844_s3 = inlined_call_operand.vmem [shape: bf16[20,40], index: 3, kind: input, shape index: {}]   ;;  %s845_s6 = inlined_call_operand.vmem [shape: bf16[8,8], index: 6, kind: input, shape index: {}]   ;;  %s846_s5 = inlined_call_operand.vmem [shape: bf16[20,1], index: 5, kind: input, shape index: {}]   ;;  %s847_s4 = inlined_call_operand.vmem [shape: bf16[20,1], index: 4, kind: input, shape index: {}]   ;;  %s848_s8 = inlined_call_operand.vmem [shape: f32[1,8], index: 8, kind: output, shape index: {}]  }
   0x1   :  { %593 = vmatprep.subr.bf16.mxu0 %v677_v0  ;;  %v662_v1 = vld [vmem:[%s840_s1] sm:$0xff]   ;;  %607 = vmatprep.mubr.msk.bf16.mxu0 %vm678_vm0, %v677_v0  ;;  %v663_v2 = vld [vmem:[%s840_s1 + $0x8] sm:$0xff]   ;;  %v664_v3 = vld [vmem:[%s840_s1 + $0x10] sm:$0xff]   ;;  %vm166_vm3 = vcmask 1041408   ;;  %vm162_vm4 = vcmask 162816   ;;  %vm290_vm5 = vcmask 1043456  }
   0x2   :  { %611 = vmatprep.subr.bf16.mxu1 %v677_v0  ;;  %615 = vmatprep.mubr.msk.bf16.mxu1 %vm678_vm0, %v677_v0  ;;  %v665_v4 = vld [vmem:[%s840_s1 + $0x18] sm:$0xff]   ;;  %v666_v5 = vld [vmem:[%s840_s1 + $0x20] sm:$0xff]   ;;  %v667_v6 = vld [vmem:[%s840_s1 + $0x28] sm:$0xff]   ;;  %vm286_vm6 = vcmask 64512   ;;  %v680_v60 = vmov 0   ;;  %vm537_vm7 = vcmask 57344  }
   0x3   :  { %594 = vmatpush3.bf16.msra.mxu0 %v662_v1  ;;  %v668_v7 = vld [vmem:[%s840_s1 + $0x30] sm:$0x3f]   ;;  %v35_v9 = vld [vmem:[%s841_s0] sm:$0xf]  ;;  %v34_v59 = vld [vmem:[%s843_s7 + $0x4] sm:$0x1]  ;;  %660 = vset.pattern.permute.xlu1 %v680_v60 }
   0x4   :  { %595 = vmatprep.subr.bf16.mxu0 %v677_v0  ;;  %v97_v8 = vsel %vm95_vm1, %v668_v7, 0  ;;  %v669_v10 = vld [vmem:[%s842_s2] sm:$0xff]   ;;  %v670_v11 = vld [vmem:[%s842_s2 + $0x8] ss:$0 sps:$4 sm:$0x33]   ;;  %661 = vset.pattern.permute.xlu0 %v680_v60 }
   0x5   :  { %612 = vmatpush3.bf16.msra.mxu1 %v669_v10  ;;  %v168_v12 = vsel %vm166_vm3, %v670_v11, 0  ;;  %v551_v13 = vld [vmem:[%s843_s7] ss:$0 sm:$0xff]  ;;  %v672_v22 = vld [vmem:[%s844_s3 + $0x8] ss:$0 sps:$4 sm:$0x33]   ;;  %533 = vperm.xlu1 %660, %v34_v59  }
   0x6   :  { %613 = vmatprep.subr.bf16.mxu1 %v677_v0  ;;  %v671_v21 = vld [vmem:[%s844_s3] sm:$0xff]   ;;  %v233_v23 = vsel %vm166_vm3, %v672_v22, 0  ;;  %v674_v55 = vld [vmem:[%s846_s5 + $0x8] ss:$0 sps:$4 sm:$0x33]  }
   0x7   :  { %596 = vmatpush3.bf16.msra.mxu0 %v663_v2  ;;  %v555_v25 = vld [vmem:[%s843_s7 + $0x1] ss:$0 sm:$0xff]  ;;  %v559_v34 = vld [vmem:[%s843_s7 + $0x2] ss:$0 sm:$0xff]  ;;  %v561_v45 = vld [vmem:[%s843_s7 + $0x3] ss:$0 sm:$0xff] }
   0x8   :  { %597 = vmatprep.subr.bf16.mxu0 %v677_v0  ;;  %v280_v42 = vld [vmem:[%s845_s6] sm:$0xf]  ;;  %v402_v56 = vsel %vm166_vm3, %v674_v55, 0  ;;  %v676_v57 = vld [vmem:[%s847_s4 + $0x8] ss:$0 sps:$4 sm:$0x33]  }
   0x9   :  { %614 = vmatpush3.bf16.msra.mxu1 %v168_v12  ;;  %v675_v43 = vld [vmem:[%s847_s4] sm:$0xff]   ;;  %v457_v58 = vsel %vm166_vm3, %v676_v57, 0 }
   0xa   :  { %619 = vmatprep.subr.bf16.mxu1 %v677_v0  ;;  %v673_v54 = vld [vmem:[%s846_s5] sm:$0xff]  }
   0xb   :  { %598 = vmatpush3.bf16.msra.mxu0 %v664_v3 }
   0xc   :  { %599 = vmatprep.subr.bf16.mxu0 %v677_v0 }
   0xf   :  { %600 = vmatpush3.bf16.msra.mxu0 %v665_v4 }
  0x10   :  { %601 = vmatprep.subr.bf16.mxu0 %v677_v0 }
  0x13   :  { %602 = vmatpush3.bf16.msra.mxu0 %v666_v5 }
  0x14   :  { %603 = vmatprep.subr.bf16.mxu0 %v677_v0 }
  0x17   :  { %604 = vmatpush3.bf16.msra.mxu0 %v667_v6 }
  0x18   :  { %605 = vmatprep.subr.bf16.mxu0 %v677_v0 }
  0x1b   :  { %606 = vmatpush3.bf16.msra.mxu0 %v97_v8 }
  0x1c   :  { %647 = vmatprep.subr.bf16.mxu0 %v677_v0 }
  0x1e   :  { %608 = vmatmul.mubr.msk.bf16.vlgmr.msra.gmra.mrb[0].mxu0 %vm91_vm2, %v35_v9 }
  0x1f   :  { %651 = vmatprep.mubr.msk.bf16.mxu0 %vm678_vm0, %v677_v0  ;;  %648 = vmatpush3.bf16.msra.mxu0 %v675_v43 }
  0x20   :  { %649 = vmatprep.subr.bf16.mxu0 %v677_v0 }
  0x23   :  { %650 = vmatpush3.bf16.msra.mxu0 %v457_v58 }
  0x84   :  { %v534_v11 = vpop.permute.xlu1 %533 }
  0xf1   :  { %v133_v14 = vpop.f32.mrb[0].mxu0 }
  0xf2   :  { %v143_v15 = vadd.f32 %v551_v13, %v133_v14  ;;  %159 = vrot.lane.b32.xlu0 %v133_v14, %s679_s25  ;;  %v609_v16 = vpop.f32.mrb[1].mxu0 }
  0xf3   :  { %v136_v17 = vpop.f32.mrb[2].mxu0 }
  0xf4   :  { %v144_v18 = vmax.f32 %v143_v15, 0.0  ;;  %v610_v19 = vpop.f32.mrb[3].mxu0 }
  0xf6   :  { %v145_v20 = vpack.c.bf16 %v144_v18, %v144_v18 }
  0xf8   :  { %616 = vmatmul.mubr.msk.bf16.vlgmr.msra.gmra.mrb[0].mxu1 %vm162_vm4, %v145_v20 }
  0xf9   :  { %623 = vmatprep.mubr.msk.bf16.mxu1 %vm678_vm0, %v677_v0  ;;  %620 = vmatpush3.bf16.msra.mxu1 %v671_v21 }
  0xfa   :  { %621 = vmatprep.subr.bf16.mxu1 %v677_v0 }
  0xfd   :  { %622 = vmatpush3.bf16.msra.mxu1 %v233_v23 }
  0xfe   :  { %627 = vmatprep.subr.bf16.mxu1 %v677_v0 }
 0x164   :  { %v160_v24 = vpop.permute.xlu0 %159 }
 0x1cb   :  { %v204_v26 = vpop.f32.mrb[0].mxu1 }
 0x1cc   :  { %v205_v27 = vadd.f32 %v204_v26, %v160_v24  ;;  %v617_v28 = vpop.f32.mrb[1].mxu1 }
 0x1cd   :  { %v207_v29 = vpop.f32.mrb[2].mxu1 }
 0x1ce   :  { %v214_v30 = vadd.f32 %v555_v25, %v205_v27  ;;  %v618_v31 = vpop.f32.mrb[3].mxu1 }
 0x1d0   :  { %v215_v32 = vmax.f32 %v214_v30, 0.0 }
 0x1d2   :  { %v216_v33 = vpack.c.bf16 %v215_v32, %v215_v32 }
 0x1d4   :  { %624 = vmatmul.mubr.msk.bf16.vlgmr.msra.gmra.mrb[4].mxu1 %vm162_vm4, %v216_v33 }
 0x1d5   :  { %629 = vmatprep.mubr.msk.bf16.mxu1 %vm678_vm0, %v677_v0 }
 0x2a7   :  { %v269_v35 = vpop.f32.mrb[4].mxu1 }
 0x2a8   :  { %v279_v36 = vadd.f32 %v559_v34, %v269_v35  ;;  %283 = vrot.lane.b32.xlu0 %v269_v35, %s679_s25  ;;  %v625_v37 = vpop.f32.mrb[5].mxu1 }
 0x2a9   :  { %v272_v38 = vpop.f32.mrb[6].mxu1 }
 0x2aa   :  { %v281_v39 = vpack.c.bf16 %v279_v36, %v279_v36  ;;  %v626_v40 = vpop.f32.mrb[7].mxu1 }
 0x2ac   :  { %v292_v41 = vsel %vm290_vm5, %v281_v39, 0 }
 0x2ad   :  { %628 = vmatpush3.bf16.msra.mxu1 %v292_v41 }
 0x2ae   :  { %633 = vmatprep.subr.bf16.mxu1 %v677_v0 }
 0x2b0   :  { %630 = vmatmul.mubr.msk.bf16.vlgmr.msra.gmra.mrb[8].mxu1 %vm286_vm6, %v280_v42 }
 0x2b1   :  { %635 = vmatprep.mubr.msk.bf16.mxu1 %vm678_vm0, %v677_v0 }
 0x31a   :  { %v284_v44 = vpop.permute.xlu0 %283 }
 0x383   :  { %v328_v46 = vpop.f32.mrb[8].mxu1 }
 0x384   :  { %v329_v47 = vadd.f32 %v328_v46, %v284_v44  ;;  %v631_v48 = vpop.f32.mrb[9].mxu1 }
 0x385   :  { %v331_v49 = vpop.f32.mrb[10].mxu1 }
 0x386   :  { %v338_v50 = vadd.f32 %v561_v45, %v329_v47  ;;  %v632_v51 = vpop.f32.mrb[11].mxu1 }
 0x388   :  { %v339_v52 = vpack.c.bf16 %v338_v50, %v338_v50 }
 0x38a   :  { %v341_v53 = vsel %vm290_vm5, %v339_v52, 0 }
 0x38b   :  { %634 = vmatpush3.bf16.msra.mxu1 %v341_v53 }
 0x38c   :  { %639 = vmatprep.subr.bf16.mxu1 %v677_v0 }
 0x38e   :  { %636 = vmatmul.mubr.msk.bf16.vlgmr.msra.gmra.mrb[12].mxu1 %vm286_vm6, %v280_v42 }
 0x38f   :  { %640 = vmatpush3.bf16.msra.mxu1 %v673_v54  ;;  %643 = vmatprep.mubr.msk.bf16.mxu1 %vm678_vm0, %v677_v0 }
 0x390   :  { %641 = vmatprep.subr.bf16.mxu1 %v677_v0 }
 0x393   :  { %642 = vmatpush3.bf16.msra.mxu1 %v402_v56 }
 0x396   :  { %644 = vmatmul.mubr.msk.bf16.vlgmr.msra.gmra.mrb[16].mxu1 %vm162_vm4, %v339_v52 }
 0x461   :  { %v377_v61 = vpop.f32.mrb[12].mxu1 }
 0x462   :  { %v383_v62 = vpack.c.bf16 %v377_v61, %v377_v61  ;;  %v637_v63 = vpop.f32.mrb[13].mxu1 }
 0x463   :  { %v380_v0 = vpop.f32.mrb[14].mxu1 }
 0x464   :  { %652 = vmatmul.mubr.msk.bf16.vlgmr.msra.gmra.mrb[4].mxu0 %vm162_vm4, %v383_v62  ;;  %v638_v1 = vpop.f32.mrb[15].mxu1 }
 0x469   :  { %v438_v2 = vpop.f32.mrb[16].mxu1 }
 0x46a   :  { %v645_v3 = vpop.f32.mrb[17].mxu1 }
 0x46b   :  { %v441_v4 = vpop.f32.mrb[18].mxu1 }
 0x46c   :  { %v646_v5 = vpop.f32.mrb[19].mxu1 }
 0x537   :  { %v493_v6 = vpop.f32.mrb[4].mxu0 }
 0x538   :  { %v494_v7 = vadd.f32 %v493_v6, %v438_v2  ;;  %v653_v8 = vpop.f32.mrb[5].mxu0 }
 0x539   :  { %v496_v9 = vpop.f32.mrb[6].mxu0 }
 0x53a   :  { %499 = vxpose.xlu1.b32.start.end [1/1] (short) (narrow) %v494_v7, 8  ;;  %v654_v10 = vpop.f32.mrb[7].mxu0 }
 0x5ba   :  { %v515_v12 = vpop.trf.xlu1 }
 0x5bb   :  { %v536_v13 = vadd.f32 %v534_v11, %v515_v12 }
 0x5bd   :  { %538 = vst.msk [vmem:[%s848_s8] sm:$0x1] %vm537_vm7, %v536_v13 }

</bundles_post_ra>
